<compile_context>
chip_gen: v7x
topology: tpu7x:2x2x1
jax: 0.10.0
libtpu: 0.0.40
codegen_flags: <defaults>
</compile_context>

<pallas_src>
import functools

import jax
import jax.numpy as jnp
from jax.experimental import pallas as pl
from jax.experimental.pallas import tpu as pltpu


def _speaker_vector_loss_kernel(alpha_ref, beta_ref, s_ref, h_ref, e_ref,
                                es0_ref, dmin_ref, lse_ref, *, time_total):
    # alpha_ref, beta_ref: (1,) f32 in SMEM
    # s_ref: (1, N, tT) i32 | h_ref: (1, N, D, tT) f32 | e_ref: (Spk, D) f32
    # es0_ref: (1, N, D) f32 | dmin_ref, lse_ref: (1, 1, 1) f32 per-batch accumulators
    t_idx = pl.program_id(1)
    alpha = alpha_ref[0]
    beta = beta_ref[0]

    n_streams = h_ref.shape[1]
    tt = h_ref.shape[3]
    spk = e_ref.shape[0]

    e = e_ref[...]                                    # (Spk, D)
    s = s_ref[0]                                      # (N, tT) int32
    h0 = h_ref[0, 0]                                  # (D, tT)
    h1 = h_ref[0, 1]                                  # (D, tT)

    # validity mask for the (possibly ragged) last time tile
    lane = jax.lax.broadcasted_iota(jnp.int32, (1, tt), 1)
    valid = (t_idx * tt + lane) < time_total          # (1, tT) bool

    # ||h - e||^2 = |h|^2 + |e|^2 - 2 h.e ; cross term on the MXU with K = Dim
    e_norm = jnp.sum(e * e, axis=1, keepdims=True)    # (Spk, 1)
    cross0 = jnp.dot(e, h0, preferred_element_type=jnp.float32)  # (Spk, tT)
    cross1 = jnp.dot(e, h1, preferred_element_type=jnp.float32)  # (Spk, tT)
    hn0 = jnp.sum(h0 * h0, axis=0, keepdims=True)     # (1, tT)
    hn1 = jnp.sum(h1 * h1, axis=0, keepdims=True)     # (1, tT)
    dist0 = hn0 + e_norm - 2.0 * cross0               # (Spk, tT): ||H[0,:,t]-E[k]||^2
    dist1 = hn1 + e_norm - 2.0 * cross1               # (Spk, tT): ||H[1,:,t]-E[k]||^2

    # logsumexp over speakers (Spk on sublanes, Time on lanes; exp/log -> EUP slot)
    sc0 = -alpha * dist0 + beta
    sc1 = -alpha * dist1 + beta
    m0 = jnp.max(sc0, axis=0, keepdims=True)          # (1, tT)
    m1 = jnp.max(sc1, axis=0, keepdims=True)
    lse0 = m0 + jnp.log(jnp.sum(jnp.exp(sc0 - m0), axis=0, keepdims=True))
    lse1 = m1 + jnp.log(jnp.sum(jnp.exp(sc1 - m1), axis=0, keepdims=True))
    lse_part = jnp.sum(jnp.where(valid, lse0 + lse1, 0.0),
                       axis=1, keepdims=True)         # (1, 1)

    # assigned-speaker distances via one-hot sublane select:
    #   dist_nn[i, j, t] = dist_j[S[i, t], t]
    spk_iota = jax.lax.broadcasted_iota(jnp.int32, (spk, tt), 0)
    oh0 = (s[0:1, :] == spk_iota).astype(jnp.float32)             # (Spk, tT)
    oh1 = (s[1:2, :] == spk_iota).astype(jnp.float32)
    d00 = jnp.sum(oh0 * dist0, axis=0, keepdims=True)             # (1, tT)
    d01 = jnp.sum(oh0 * dist1, axis=0, keepdims=True)
    d10 = jnp.sum(oh1 * dist0, axis=0, keepdims=True)
    d11 = jnp.sum(oh1 * dist1, axis=0, keepdims=True)
    # permutation paths for N == 2: {(0,0),(1,1)} and {(0,1),(1,0)}
    d_min = jnp.minimum(d00 + d11, d01 + d10)                     # (1, tT)
    dmin_part = jnp.sum(jnp.where(valid, -alpha * d_min + beta, 0.0),
                        axis=1, keepdims=True)                    # (1, 1)

    @pl.when(t_idx == 0)
    def _init():
        dmin_ref[...] = jnp.zeros_like(dmin_ref)
        lse_ref[...] = jnp.zeros_like(lse_ref)
        # E_S[:, :, :, 0]: embeddings of the speakers active at global t = 0
        oh_t0 = (s[:, 0:1] ==
                 jax.lax.broadcasted_iota(jnp.int32, (n_streams, spk), 1))
        es0_ref[0] = jnp.dot(oh_t0.astype(jnp.float32), e,
                             preferred_element_type=jnp.float32)

    dmin_ref[...] = dmin_ref[...] + dmin_part.reshape(dmin_ref.shape)
    lse_ref[...] = lse_ref[...] + lse_part.reshape(lse_ref.shape)


def speaker_vector_loss(H, S, E, alpha, beta, *, time_tile=None):
    """H: (B, N, Dim, Time) f32, S: (B, N, Time) i32, E: (Spk, Dim) f32."""
    B, Nn, D, T = H.shape
    Spk, D_ = E.shape
    assert D == D_
    assert Nn == 2, "permutation paths are hard-coded for N == 2 (as in the torch module)"

    if time_tile is None:
        # keep double-buffered H tiles + (Spk, tT) intermediates well inside the
        # default scoped VMEM limit on all generations (incl. v7x's 64 MiB VMEM)
        time_tile = T if T <= 512 else 512
    n_t_tiles = pl.cdiv(T, time_tile)

    kernel = functools.partial(_speaker_vector_loss_kernel, time_total=T)

    es0, dmin_sum, lse_sum = pl.pallas_call(
        kernel,
        grid=(B, n_t_tiles),
        in_specs=[
            pl.BlockSpec(memory_space=pltpu.MemorySpace.SMEM),               # alpha (1,)
            pl.BlockSpec(memory_space=pltpu.MemorySpace.SMEM),               # beta  (1,)
            pl.BlockSpec((1, Nn, time_tile), lambda b, t: (b, 0, t)),        # S
            pl.BlockSpec((1, Nn, D, time_tile), lambda b, t: (b, 0, 0, t)),  # H (native)
            pl.BlockSpec((Spk, D), lambda b, t: (0, 0)),                     # E (resident)
        ],
        out_specs=[
            pl.BlockSpec((1, Nn, D), lambda b, t: (b, 0, 0)),   # E_S at t = 0
            pl.BlockSpec((1, 1, 1), lambda b, t: (b, 0, 0)),    # sum_t of min-path term
            pl.BlockSpec((1, 1, 1), lambda b, t: (b, 0, 0)),    # sum_{n,t} of logsumexp
        ],
        out_shape=[
            jax.ShapeDtypeStruct((B, Nn, D), jnp.float32),
            jax.ShapeDtypeStruct((B, 1, 1), jnp.float32),
            jax.ShapeDtypeStruct((B, 1, 1), jnp.float32),
        ],
        compiler_params=pltpu.CompilerParams(
            dimension_semantics=("parallel", "arbitrary")),
    )(alpha, beta, S, H, E)

    # final scalar means (cheap glue, matches the torch reductions exactly)
    loss = (-jnp.sum(dmin_sum) / (B * T)
            + jnp.sum(lse_sum) / (B * Nn * T))
    return es0, loss


def _reference(H, S, E, alpha, beta):
    """Pure-JAX transcription of the PyTorch forward, for validation."""
    E_S = jnp.transpose(E[S], (0, 1, 3, 2))                          # (B, N, D, T)
    dist_nn = jnp.sum((H[:, None] - E_S[:, :, None]) ** 2, axis=3)   # (B, i, j, T)
    d0 = dist_nn[:, 0, 0] + dist_nn[:, 1, 1]
    d1 = dist_nn[:, 0, 1] + dist_nn[:, 1, 0]
    dmin = -alpha * jnp.minimum(d0, d1) + beta                       # (B, T)
    dist = jnp.sum((H[:, None] - E[None, :, None, :, None]) ** 2, axis=3)  # (B,Spk,N,T)
    dist = -alpha * dist + beta
    loss = -jnp.mean(dmin) + jnp.mean(jax.scipy.special.logsumexp(dist, axis=1))
    return E_S[:, :, :, 0], loss


if __name__ == "__main__":
    # Small shapes consistent with the module's forward.
    B, Nn, D, T, Spk = 2, 2, 32, 16, 8

    key = jax.random.PRNGKey(0)
    k1, k2, k3 = jax.random.split(key, 3)
    H = jax.random.normal(k1, (B, Nn, D, T), dtype=jnp.float32)
    S = jax.random.randint(k2, (B, Nn, T), 0, Spk, dtype=jnp.int32)
    E = jax.random.normal(k3, (Spk, D), dtype=jnp.float32)

    # Deterministic parameter init, as in the module's __init__ (alpha=10, beta=5).
    alpha = jnp.ones((1,), jnp.float32) * 10.0
    beta = jnp.ones((1,), jnp.float32) * 5.0
    # TODO(synk): nn.CrossEntropyLoss is constructed in __init__ but never used in forward.

    es0, loss = speaker_vector_loss(H, S, E, alpha, beta)
    jax.block_until_ready((es0, loss))

    es0_ref, loss_ref = _reference(H, S, E, alpha, beta)
    assert es0.shape == (B, Nn, D)
    assert jnp.allclose(es0, es0_ref, rtol=1e-5, atol=1e-5)
    assert jnp.allclose(loss, loss_ref, rtol=1e-4, atol=1e-2)

    print("KERNEL_OK")
</pallas_src>

<mosaic_0001>
module attributes {stable_mosaic.version = 11 : i64} {
  func.func @_speaker_vector_loss_kernel(%arg0: i32, %arg1: i32, %arg2: memref<1xf32, #tpu.memory_space<smem>>, %arg3: memref<1xf32, #tpu.memory_space<smem>>, %arg4: memref<1x2x16xi32, #tpu.memory_space<vmem>>, %arg5: memref<1x2x32x16xf32, #tpu.memory_space<vmem>>, %arg6: memref<8x32xf32, #tpu.memory_space<vmem>>, %arg7: memref<1x2x32xf32, #tpu.memory_space<vmem>>, %arg8: memref<1x1x1xf32, #tpu.memory_space<vmem>>, %arg9: memref<1x1x1xf32, #tpu.memory_space<vmem>>) attributes {dimension_semantics = [#tpu.dimension_semantics<parallel>, #tpu.dimension_semantics<arbitrary>], iteration_bounds = array<i64: 2, 1>, scalar_prefetch = 0 : i64, scratch_operands = 0 : i64, tpu.core_type = #tpu.core_type<tc>, window_params = [{transform_indices = @transform_0, window_bounds = array<i64: 1>}, {transform_indices = @transform_1, window_bounds = array<i64: 1>}, {transform_indices = @transform_2, window_bounds = array<i64: 1, 2, 16>}, {transform_indices = @transform_3, window_bounds = array<i64: 1, 2, 32, 16>}, {pipeline_mode = #tpu.pipeline_mode<synchronous>, transform_indices = @transform_4, window_bounds = array<i64: 8, 32>}, {transform_indices = @transform_5, window_bounds = array<i64: 1, 2, 32>}, {transform_indices = @transform_6, window_bounds = array<i64: 1, 1, 1>}, {transform_indices = @transform_7, window_bounds = array<i64: 1, 1, 1>}]} {
    %c0 = arith.constant 0 : index
    %0 = memref.load %arg2[%c0] : memref<1xf32, #tpu.memory_space<smem>>
    %c0_0 = arith.constant 0 : index
    %1 = memref.load %arg3[%c0_0] : memref<1xf32, #tpu.memory_space<smem>>
    %c0_1 = arith.constant 0 : index
    %c0_2 = arith.constant 0 : index
    %2 = vector.load %arg6[%c0_1, %c0_2] : memref<8x32xf32, #tpu.memory_space<vmem>>, vector<8x32xf32>
    %c0_3 = arith.constant 0 : index
    %c0_4 = arith.constant 0 : index
    %c0_5 = arith.constant 0 : index
    %3 = vector.load %arg4[%c0_3, %c0_4, %c0_5] : memref<1x2x16xi32, #tpu.memory_space<vmem>>, vector<1x2x16xi32>
    %4 = vector.shape_cast %3 : vector<1x2x16xi32> to vector<2x16xi32>
    %c0_6 = arith.constant 0 : index
    %c0_7 = arith.constant 0 : index
    %c0_8 = arith.constant 0 : index
    %c0_9 = arith.constant 0 : index
    %5 = vector.load %arg5[%c0_6, %c0_7, %c0_8, %c0_9] : memref<1x2x32x16xf32, #tpu.memory_space<vmem>>, vector<1x1x32x16xf32>
    %6 = vector.shape_cast %5 : vector<1x1x32x16xf32> to vector<32x16xf32>
    %c0_10 = arith.constant 0 : index
    %c1 = arith.constant 1 : index
    %c0_11 = arith.constant 0 : index
    %c0_12 = arith.constant 0 : index
    %7 = vector.load %arg5[%c0_10, %c1, %c0_11, %c0_12] : memref<1x2x32x16xf32, #tpu.memory_space<vmem>>, vector<1x1x32x16xf32>
    %8 = vector.shape_cast %7 : vector<1x1x32x16xf32> to vector<32x16xf32>
    %9 = tpu.iota {dimensions = array<i32: 1>} : vector<1x16xi32>
    %c16_i32 = arith.constant 16 : i32
    %10 = arith.muli %arg1, %c16_i32 : i32
    %11 = vector.broadcast %10 : i32 to vector<1x16xi32>
    %12 = arith.addi %11, %9 : vector<1x16xi32>
    %c16_i32_13 = arith.constant 16 : i32
    %13 = vector.broadcast %c16_i32_13 : i32 to vector<1x16xi32>
    %14 = arith.cmpi slt, %12, %13 : vector<1x16xi32>
    %15 = arith.mulf %2, %2 : vector<8x32xf32>
    %cst = arith.constant dense<0.000000e+00> : vector<8xf32>
    %16 = vector.multi_reduction <add>, %15, %cst [1] : vector<8x32xf32> to vector<8xf32>
    %17 = vector.shape_cast %16 : vector<8xf32> to vector<8x1xf32>
    %cst_14 = arith.constant dense<0.000000e+00> : vector<8x16xf32>
    %18 = tpu.matmul %2, %6, %cst_14 {dimension_numbers = #tpu.dot_dimension_numbers<[1], [0], [0], [1], [0, 0, 1, 1], [], []>} : vector<8x32xf32>, vector<32x16xf32>, vector<8x16xf32> -> vector<8x16xf32>
    %cst_15 = arith.constant dense<0.000000e+00> : vector<8x16xf32>
    %19 = tpu.matmul %2, %8, %cst_15 {dimension_numbers = #tpu.dot_dimension_numbers<[1], [0], [0], [1], [0, 0, 1, 1], [], []>} : vector<8x32xf32>, vector<32x16xf32>, vector<8x16xf32> -> vector<8x16xf32>
    %20 = arith.mulf %6, %6 : vector<32x16xf32>
    %cst_16 = arith.constant dense<0.000000e+00> : vector<16xf32>
    %21 = vector.multi_reduction <add>, %20, %cst_16 [0] : vector<32x16xf32> to vector<16xf32>
    %22 = vector.shape_cast %21 : vector<16xf32> to vector<1x16xf32>
    %23 = arith.mulf %8, %8 : vector<32x16xf32>
    %cst_17 = arith.constant dense<0.000000e+00> : vector<16xf32>
    %24 = vector.multi_reduction <add>, %23, %cst_17 [0] : vector<32x16xf32> to vector<16xf32>
    %25 = vector.shape_cast %24 : vector<16xf32> to vector<1x16xf32>
    %26 = vector.broadcast %22 : vector<1x16xf32> to vector<8x16xf32>
    %27 = vector.broadcast %17 : vector<8x1xf32> to vector<8x16xf32>
    %28 = arith.addf %26, %27 : vector<8x16xf32>
    %cst_18 = arith.constant 2.000000e+00 : f32
    %29 = vector.broadcast %cst_18 : f32 to vector<8x16xf32>
    %30 = arith.mulf %29, %18 : vector<8x16xf32>
    %31 = arith.subf %28, %30 : vector<8x16xf32>
    %32 = vector.broadcast %25 : vector<1x16xf32> to vector<8x16xf32>
    %33 = vector.broadcast %17 : vector<8x1xf32> to vector<8x16xf32>
    %34 = arith.addf %32, %33 : vector<8x16xf32>
    %cst_19 = arith.constant 2.000000e+00 : f32
    %35 = vector.broadcast %cst_19 : f32 to vector<8x16xf32>
    %36 = arith.mulf %35, %19 : vector<8x16xf32>
    %37 = arith.subf %34, %36 : vector<8x16xf32>
    %cst_20 = arith.constant 0.000000e+00 : f32
    %38 = arith.subf %cst_20, %0 : f32
    %39 = vector.broadcast %38 : f32 to vector<8x16xf32>
    %40 = arith.mulf %39, %31 : vector<8x16xf32>
    %41 = vector.broadcast %1 : f32 to vector<8x16xf32>
    %42 = arith.addf %40, %41 : vector<8x16xf32>
    %cst_21 = arith.constant 0.000000e+00 : f32
    %43 = arith.subf %cst_21, %0 : f32
    %44 = vector.broadcast %43 : f32 to vector<8x16xf32>
    %45 = arith.mulf %44, %37 : vector<8x16xf32>
    %46 = vector.broadcast %1 : f32 to vector<8x16xf32>
    %47 = arith.addf %45, %46 : vector<8x16xf32>
    %cst_22 = arith.constant dense<0xFF800000> : vector<16xf32>
    %48 = vector.multi_reduction <maximumf>, %42, %cst_22 [0] : vector<8x16xf32> to vector<16xf32>
    %49 = vector.shape_cast %48 : vector<16xf32> to vector<1x16xf32>
    %cst_23 = arith.constant dense<0xFF800000> : vector<16xf32>
    %50 = vector.multi_reduction <maximumf>, %47, %cst_23 [0] : vector<8x16xf32> to vector<16xf32>
    %51 = vector.shape_cast %50 : vector<16xf32> to vector<1x16xf32>
    %52 = vector.broadcast %49 : vector<1x16xf32> to vector<8x16xf32>
    %53 = arith.subf %42, %52 : vector<8x16xf32>
    %54 = math.exp %53 : vector<8x16xf32>
    %cst_24 = arith.constant dense<0.000000e+00> : vector<16xf32>
    %55 = vector.multi_reduction <add>, %54, %cst_24 [0] : vector<8x16xf32> to vector<16xf32>
    %56 = vector.shape_cast %55 : vector<16xf32> to vector<1x16xf32>
    %57 = math.log %56 : vector<1x16xf32>
    %58 = arith.addf %49, %57 : vector<1x16xf32>
    %59 = vector.broadcast %51 : vector<1x16xf32> to vector<8x16xf32>
    %60 = arith.subf %47, %59 : vector<8x16xf32>
    %61 = math.exp %60 : vector<8x16xf32>
    %cst_25 = arith.constant dense<0.000000e+00> : vector<16xf32>
    %62 = vector.multi_reduction <add>, %61, %cst_25 [0] : vector<8x16xf32> to vector<16xf32>
    %63 = vector.shape_cast %62 : vector<16xf32> to vector<1x16xf32>
    %64 = math.log %63 : vector<1x16xf32>
    %65 = arith.addf %51, %64 : vector<1x16xf32>
    %66 = arith.addf %58, %65 : vector<1x16xf32>
    %cst_26 = arith.constant 0.000000e+00 : f32
    %67 = vector.broadcast %cst_26 : f32 to vector<1x16xf32>
    %68 = arith.select %14, %66, %67 : vector<1x16xi1>, vector<1x16xf32>
    %cst_27 = arith.constant dense<0.000000e+00> : vector<1xf32>
    %69 = vector.multi_reduction <add>, %68, %cst_27 [1] : vector<1x16xf32> to vector<1xf32>
    %70 = vector.shape_cast %69 : vector<1xf32> to vector<1x1xf32>
    %71 = tpu.iota {dimensions = array<i32: 0>} : vector<8x16xi32>
    %72 = vector.extract_strided_slice %4 {offsets = [0, 0], sizes = [1, 16], strides = [1, 1]} : vector<2x16xi32> to vector<1x16xi32>
    %73 = vector.broadcast %72 : vector<1x16xi32> to vector<8x16xi32>
    %74 = arith.cmpi eq, %73, %71 : vector<8x16xi32>
    %75 = arith.extui %74 : vector<8x16xi1> to vector<8x16xi32>
    %76 = arith.sitofp %75 : vector<8x16xi32> to vector<8x16xf32>
    %77 = vector.extract_strided_slice %4 {offsets = [1, 0], sizes = [1, 16], strides = [1, 1]} : vector<2x16xi32> to vector<1x16xi32>
    %78 = vector.broadcast %77 : vector<1x16xi32> to vector<8x16xi32>
    %79 = arith.cmpi eq, %78, %71 : vector<8x16xi32>
    %80 = arith.extui %79 : vector<8x16xi1> to vector<8x16xi32>
    %81 = arith.sitofp %80 : vector<8x16xi32> to vector<8x16xf32>
    %82 = arith.mulf %76, %31 : vector<8x16xf32>
    %cst_28 = arith.constant dense<0.000000e+00> : vector<16xf32>
    %83 = vector.multi_reduction <add>, %82, %cst_28 [0] : vector<8x16xf32> to vector<16xf32>
    %84 = vector.shape_cast %83 : vector<16xf32> to vector<1x16xf32>
    %85 = arith.mulf %76, %37 : vector<8x16xf32>
    %cst_29 = arith.constant dense<0.000000e+00> : vector<16xf32>
    %86 = vector.multi_reduction <add>, %85, %cst_29 [0] : vector<8x16xf32> to vector<16xf32>
    %87 = vector.shape_cast %86 : vector<16xf32> to vector<1x16xf32>
    %88 = arith.mulf %81, %31 : vector<8x16xf32>
    %cst_30 = arith.constant dense<0.000000e+00> : vector<16xf32>
    %89 = vector.multi_reduction <add>, %88, %cst_30 [0] : vector<8x16xf32> to vector<16xf32>
    %90 = vector.shape_cast %89 : vector<16xf32> to vector<1x16xf32>
    %91 = arith.mulf %81, %37 : vector<8x16xf32>
    %cst_31 = arith.constant dense<0.000000e+00> : vector<16xf32>
    %92 = vector.multi_reduction <add>, %91, %cst_31 [0] : vector<8x16xf32> to vector<16xf32>
    %93 = vector.shape_cast %92 : vector<16xf32> to vector<1x16xf32>
    %94 = arith.addf %84, %93 : vector<1x16xf32>
    %95 = arith.addf %87, %90 : vector<1x16xf32>
    %96 = arith.minimumf %94, %95 : vector<1x16xf32>
    %cst_32 = arith.constant 0.000000e+00 : f32
    %97 = arith.subf %cst_32, %0 : f32
    %98 = vector.broadcast %97 : f32 to vector<1x16xf32>
    %99 = arith.mulf %98, %96 : vector<1x16xf32>
    %100 = vector.broadcast %1 : f32 to vector<1x16xf32>
    %101 = arith.addf %99, %100 : vector<1x16xf32>
    %cst_33 = arith.constant 0.000000e+00 : f32
    %102 = vector.broadcast %cst_33 : f32 to vector<1x16xf32>
    %103 = arith.select %14, %101, %102 : vector<1x16xi1>, vector<1x16xf32>
    %cst_34 = arith.constant dense<0.000000e+00> : vector<1xf32>
    %104 = vector.multi_reduction <add>, %103, %cst_34 [1] : vector<1x16xf32> to vector<1xf32>
    %105 = vector.shape_cast %104 : vector<1xf32> to vector<1x1xf32>
    %c0_i32 = arith.constant 0 : i32
    %106 = arith.cmpi eq, %arg1, %c0_i32 : i32
    %107 = arith.extui %106 : i1 to i32
    %c0_i32_35 = arith.constant 0 : i32
    %108 = arith.cmpi ne, %107, %c0_i32_35 : i32
    scf.if %108 {
      %cst_48 = arith.constant 0.000000e+00 : f32
      %117 = vector.broadcast %cst_48 : f32 to vector<1x1x1xf32>
      %c0_49 = arith.constant 0 : index
      %c0_50 = arith.constant 0 : index
      %c0_51 = arith.constant 0 : index
      %118 = vector.load %arg8[%c0_49, %c0_50, %c0_51] : memref<1x1x1xf32, #tpu.memory_space<vmem>>, vector<1x1x1xf32>
      tpu.vector_store %arg8[%c0_49, %c0_50, %c0_51], %117 {strides = array<i32>} : memref<1x1x1xf32, #tpu.memory_space<vmem>>, vector<1x1x1xf32>,
      %cst_52 = arith.constant 0.000000e+00 : f32
      %119 = vector.broadcast %cst_52 : f32 to vector<1x1x1xf32>
      %c0_53 = arith.constant 0 : index
      %c0_54 = arith.constant 0 : index
      %c0_55 = arith.constant 0 : index
      %120 = vector.load %arg9[%c0_53, %c0_54, %c0_55] : memref<1x1x1xf32, #tpu.memory_space<vmem>>, vector<1x1x1xf32>
      tpu.vector_store %arg9[%c0_53, %c0_54, %c0_55], %119 {strides = array<i32>} : memref<1x1x1xf32, #tpu.memory_space<vmem>>, vector<1x1x1xf32>,
      %121 = vector.extract_strided_slice %4 {offsets = [0, 0], sizes = [2, 1], strides = [1, 1]} : vector<2x16xi32> to vector<2x1xi32>
      %122 = tpu.iota {dimensions = array<i32: 1>} : vector<2x8xi32>
      %123 = vector.broadcast %121 : vector<2x1xi32> to vector<2x8xi32>
      %124 = arith.cmpi eq, %123, %122 : vector<2x8xi32>
      %125 = arith.extui %124 : vector<2x8xi1> to vector<2x8xi32>
      %126 = arith.sitofp %125 : vector<2x8xi32> to vector<2x8xf32>
      %cst_56 = arith.constant dense<0.000000e+00> : vector<2x32xf32>
      %127 = tpu.matmul %126, %2, %cst_56 {dimension_numbers = #tpu.dot_dimension_numbers<[1], [0], [0], [1], [0, 0, 1, 1], [], []>} : vector<2x8xf32>, vector<8x32xf32>, vector<2x32xf32> -> vector<2x32xf32>
      %c0_57 = arith.constant 0 : index
      %c0_58 = arith.constant 0 : index
      %c0_59 = arith.constant 0 : index
      %128 = vector.load %arg7[%c0_57, %c0_58, %c0_59] : memref<1x2x32xf32, #tpu.memory_space<vmem>>, vector<1x2x32xf32>
      %129 = vector.shape_cast %128 : vector<1x2x32xf32> to vector<2x32xf32>
      %130 = vector.shape_cast %127 : vector<2x32xf32> to vector<1x2x32xf32>
      tpu.vector_store %arg7[%c0_57, %c0_58, %c0_59], %130 {strides = array<i32>} : memref<1x2x32xf32, #tpu.memory_space<vmem>>, vector<1x2x32xf32>,
    } else {
    }
    %c0_36 = arith.constant 0 : index
    %c0_37 = arith.constant 0 : index
    %c0_38 = arith.constant 0 : index
    %109 = vector.load %arg8[%c0_36, %c0_37, %c0_38] : memref<1x1x1xf32, #tpu.memory_space<vmem>>, vector<1x1x1xf32>
    %110 = vector.shape_cast %105 : vector<1x1xf32> to vector<1x1x1xf32>
    %111 = arith.addf %109, %110 : vector<1x1x1xf32>
    %c0_39 = arith.constant 0 : index
    %c0_40 = arith.constant 0 : index
    %c0_41 = arith.constant 0 : index
    %112 = vector.load %arg8[%c0_39, %c0_40, %c0_41] : memref<1x1x1xf32, #tpu.memory_space<vmem>>, vector<1x1x1xf32>
    tpu.vector_store %arg8[%c0_39, %c0_40, %c0_41], %111 {strides = array<i32>} : memref<1x1x1xf32, #tpu.memory_space<vmem>>, vector<1x1x1xf32>,
    %c0_42 = arith.constant 0 : index
    %c0_43 = arith.constant 0 : index
    %c0_44 = arith.constant 0 : index
    %113 = vector.load %arg9[%c0_42, %c0_43, %c0_44] : memref<1x1x1xf32, #tpu.memory_space<vmem>>, vector<1x1x1xf32>
    %114 = vector.shape_cast %70 : vector<1x1xf32> to vector<1x1x1xf32>
    %115 = arith.addf %113, %114 : vector<1x1x1xf32>
    %c0_45 = arith.constant 0 : index
    %c0_46 = arith.constant 0 : index
    %c0_47 = arith.constant 0 : index
    %116 = vector.load %arg9[%c0_45, %c0_46, %c0_47] : memref<1x1x1xf32, #tpu.memory_space<vmem>>, vector<1x1x1xf32>
    tpu.vector_store %arg9[%c0_45, %c0_46, %c0_47], %115 {strides = array<i32>} : memref<1x1x1xf32, #tpu.memory_space<vmem>>, vector<1x1x1xf32>,
    return
  }
  func.func @transform_0(%arg0: i32, %arg1: i32) -> i32 {
    %c0_i32 = arith.constant 0 : i32
    %c0_i32_0 = arith.constant 0 : i32
    return %c0_i32 : i32
  }
  func.func @transform_1(%arg0: i32, %arg1: i32) -> i32 {
    %c0_i32 = arith.constant 0 : i32
    %c0_i32_0 = arith.constant 0 : i32
    return %c0_i32 : i32
  }
  func.func @transform_2(%arg0: i32, %arg1: i32) -> (i32, i32, i32) {
    %c0_i32 = arith.constant 0 : i32
    %c0_i32_0 = arith.constant 0 : i32
    return %arg0, %c0_i32, %arg1 : i32, i32, i32
  }
  func.func @transform_3(%arg0: i32, %arg1: i32) -> (i32, i32, i32, i32) {
    %c0_i32 = arith.constant 0 : i32
    %c0_i32_0 = arith.constant 0 : i32
    %c0_i32_1 = arith.constant 0 : i32
    return %arg0, %c0_i32, %c0_i32_0, %arg1 : i32, i32, i32, i32
  }
  func.func @transform_4(%arg0: i32, %arg1: i32) -> (i32, i32) {
    %c0_i32 = arith.constant 0 : i32
    %c0_i32_0 = arith.constant 0 : i32
    %c0_i32_1 = arith.constant 0 : i32
    return %c0_i32, %c0_i32_0 : i32, i32
  }
  func.func @transform_5(%arg0: i32, %arg1: i32) -> (i32, i32, i32) {
    %c0_i32 = arith.constant 0 : i32
    %c0_i32_0 = arith.constant 0 : i32
    %c0_i32_1 = arith.constant 0 : i32
    return %arg0, %c0_i32, %c0_i32_0 : i32, i32, i32
  }
  func.func @transform_6(%arg0: i32, %arg1: i32) -> (i32, i32, i32) {
    %c0_i32 = arith.constant 0 : i32
    %c0_i32_0 = arith.constant 0 : i32
    %c0_i32_1 = arith.constant 0 : i32
    return %arg0, %c0_i32, %c0_i32_0 : i32, i32, i32
  }
  func.func @transform_7(%arg0: i32, %arg1: i32) -> (i32, i32, i32) {
    %c0_i32 = arith.constant 0 : i32
    %c0_i32_0 = arith.constant 0 : i32
    %c0_i32_1 = arith.constant 0 : i32
    return %arg0, %c0_i32, %c0_i32_0 : i32, i32, i32
  }
}

</mosaic_0001>

<bundles_post_ra>
// kernel: tpu_custom_call.1
= control target key start
LH: loop header
LB: loop body
LE: loop exit
PB: predicated region body
PF: predicated region fallthrough
CT: control target
= control target key end

     0   :  { %s1390_s0 = inlined_call_operand.<no memory space> [shape: f32[1], index: 0, kind: input, shape index: {}]   ;;  %s1391_s1 = inlined_call_operand.<no memory space> [shape: f32[1], index: 1, kind: input, shape index: {}]   ;;  %s1392_s2 = inlined_call_operand.vmem [shape: s32[2,2,16], index: 2, kind: input, shape index: {}]   ;;  %s1393_s3 = inlined_call_operand.vmem [shape: f32[2,2,32,16], index: 3, kind: input, shape index: {}]   ;;  %s1394_s4 = inlined_call_operand.vmem [shape: f32[8,32], index: 4, kind: input, shape index: {}]   ;;  %s1395_s5 = inlined_call_operand.hbm [shape: f32[2,2,32], index: 5, kind: output, shape index: {0}]   ;;  %s1396_s6 = inlined_call_operand.vmem [shape: f32[2,1,1], index: 6, kind: output, shape index: {1}]   ;;  %s1397_s7 = inlined_call_operand.vmem [shape: f32[2,1,1], index: 7, kind: output, shape index: {2}]  }
   0x1   :  { %13 = sst [smem:[#allocation2]] %s1390_s0 }
   0x2   :  { %14 = sst [smem:[#allocation3]] %s1391_s1 }
   0x3   :  { %15 = vsyncpa [#allocation5], 0 }
   0x4   :  { %17 = vsyncpa [#allocation5 + $0x1], 0  ;;  %s1186_s28 = smov 0   ;;  %s1188_s29 = smov 0  }
   0x5   :  { %s1190_s30 = smov 0   ;;  %s1192_s8 = smov 0  }
   0x6   :  { %s1194_s9 = smov 0   ;;  %s1196_s10 = smov 0  }
   0x7 LB: > { %s912_s0 = sadd.s32 4294967295, %s1133_s10   ;;  %s913_s1 = sadd.s32 4294967294, %s1133_s10   ;;  %s1133_s10 = sphi %s1196_s10, %s23_s10   ;;  %s1129_s9 = sphi %s1194_s9, %s1404_s9   ;;  %s1125_s8 = sphi %s1192_s8, %s1403_s8   ;;  %s1121_s30 = sphi %s1190_s30, %s1402_s30   ;;  %s1117_s29 = sphi %s1188_s29, %s1401_s29   ;;  %s1113_s28 = sphi %s1186_s28, %s1400_s28  }
   0x8   : > { %s35_s11 = sadd.s32 1, %s1129_s9  ;;  %s161_s12 = sadd.s32 1, %s1121_s30 }
   0x9   : > { %p37_p0 = scmp.ge.s32.totalorder %s35_s11, 2  ;;  %p171_p1 = scmp.ne.s32.totalorder %s1121_s30, %s1117_s29 }
   0xa   : > { %p172_p2 = scmp.eq.s32.totalorder %s912_s0, 1  ;;  %p177_p3 = scmp.ne.s32.totalorder %s1117_s29, %s1113_s28 }
   0xb   : > { %s1406_s11 = smov (%p37_p0, %s35_s11), 0  ;;  %p178_p5 = scmp.eq.s32.totalorder %s913_s1, 1 }
   0xc   : > { %p1226_p4 = por %p172_p2, %p171_p1  ;;  %s158_s14 = ssub.s32 %s1129_s9, %s1406_s11 }
   0xd   : > { %p916_p6 = scmp.ge.s32.totalorder %s1133_s10, 1  ;;  %p159_p7 = scmp.eq.s32.totalorder %s158_s14, 0 }
   0xe   : > { %p1233_p8 = por %p178_p5, %p177_p3  ;;  %p278_p9 = scmp.lt.s32.totalorder %s1133_s10, 3 }
   0xf   : > { %s1239_s16 = scalar_select %p159_p7, %s1121_s30, %s161_s12  }
  0x10   : > { %p279_p10 = pnand %p916_p6, %p278_p9 }
  0x11   : > { %p326_p11 = scmp.lt.s32.totalorder (!%p279_p10), %s1125_s8, 1  ;;  %v1135_v0 = vmov (!%p279_p10), 0.0|0.0   ;;  %v360_v1 = vlaneseq (!%p279_p10)  ;;  %vm1136_vm0 = vmmov (!%p279_p10), 0   ;;  %v1137_v2 = vmov (!%p279_p10), 0.0   ;;  %v349_v37 = vld [vmem:[%s1394_s4] sm:$0xff] (!%p279_p10)  ;;  %s347_s0 = sld [smem:[#allocation2]] (!%p279_p10) }
  0x12   : > { %282 = sbr.rel (%p279_p10) target bundleno = 469 (0x1d5), region = 40  ;;  %975 = vmatprep.subr.bf16.mxu0 (!%p279_p10), %v1135_v0  ;;  %981 = vmatprep.subr.bf16.mxu1 (!%p279_p10), %v1135_v0  ;;  %v1138_v3 = vmov (!%p279_p10), 0   ;;  %vm518_vm1 = vcmask (!%p279_p10), 130048   ;;  %vm367_vm2 = vcmask (!%p279_p10), 261120   ;;  %v366_v39 = vmul.f32 (!%p279_p10), %v349_v37, %v349_v37  ;;  %s348_s1 = sld [smem:[#allocation3]] (!%p279_p10) }
  0x13   : > { %956 = vmatprep.mubr.msk.f32.mxu0 (!%p279_p10), %vm1136_vm0, %v1137_v2  ;;  %967 = vmatprep.mubr.msk.f32.mxu1 (!%p279_p10), %vm1136_vm0, %v1137_v2  ;;  %v1250_v4 = vshrl.u32 (!%p279_p10), %v360_v1, 7  ;;  %v1279_v47 = vand.u32 (!%p279_p10), 127, %v360_v1  ;;  %vm677_vm5 = vcmask (!%p279_p10), 64512   ;;  %vm668_vm7 = vcmask (!%p279_p10), 0   ;;  %s313_s23 = sand.u32 (!%p279_p10), 1, %s1117_s29  }
  0x14   : > { %1046 = vset.pattern.permute.xlu0 (!%p279_p10), %v1138_v3  ;;  %v368_v40 = vsel (!%p279_p10), %vm367_vm2, %v366_v39, 0.0  ;;  %s917_s24 = sshll.u32 (!%p279_p10), %s313_s23, 1  ;;  %vm751_vm9 = vcmask (!%p279_p10), 254976  }
  0x15   : > { %v611_v8 = vsub.s32 (!%p279_p10), 0, %v1250_v4  ;;  %v618_v22 = vsub.s32 (!%p279_p10), 1, %v1250_v4  ;;  %vm365_vm8 = vcmp.lt.s32.totalorder (!%p279_p10), %v1279_v47, 16  ;;  %s315_s26 = scalar_lea.vmem (!%p279_p10), [#allocation4], %s917_s24 }
  0x16   : > { %s780_s27 = sshll.u32 (!%p279_p10), %s315_s26, 4  ;;  %s1339_s27 = int_to_ptr.vmem [resolvable:$true] %s780_s27 }
  0x17   : > { %s1055_s14 = scalar_lea.vmem (!%p279_p10), %s1339_s27, 32 }
  0x18   : > { %p1056_p12 = scmp.ne.s32.totalorder (!%p279_p10), %s1339_s27, %s1055_s14 }
  0x19   : > { %s1243_s17 = scalar_select %p326_p11, %s1125_s8, 1 }
  0x1a   : > { %p1057_p13 = pnand %p1056_p12, %p1226_p4 }
  0x1b   : > { %s935_s18 = sshll.u32 %s1243_s17, 6  ;;  %s918_s19 = sshll.u32 %s1243_s17, 1 }
  0x1c   : > { %s340_s22 = scalar_lea.vmem %s1393_s3, %s935_s18  ;;  %s332_s25 = scalar_lea.vmem %s1392_s2, %s918_s19 }
  0x1d   : > { %v351_v5 = vld [vmem:[%s340_s22] sm:$0xff]  ;;  %v352_v6 = vld [vmem:[%s340_s22 + $0x8] sm:$0xff]  ;;  %v353_v14 = vld [vmem:[%s340_s22 + $0x10] sm:$0xff]  ;;  %s1287_s18 = scalar_lea.vmem %s1397_s7, %s1243_s17  ;;  %s555_s19 = ssub.f32 0.0, %s347_s0 }
  0x1e   : > { %v921_v7 = vld [vmem:[%s340_s22 + $0x20] sm:$0xff]  ;;  %v976_v9 = vpack.c.bf16 %v352_v6, %v351_v5  ;;  %v514_v10 = vmul.f32 %v351_v5, %v351_v5  ;;  %v515_v11 = vmul.f32 %v352_v6, %v352_v6  ;;  %v922_v12 = vld [vmem:[%s340_s22 + $0x28] sm:$0xff]  ;;  %v354_v15 = vld [vmem:[%s340_s22 + $0x18] sm:$0xff]  ;;  %v516_v18 = vmul.f32 %v353_v14, %v353_v14  ;;  %670 = vst.msk [vmem:[%s1287_s18] sm:$0x1] %vm668_vm7, %v1137_v2  ;;  %p1058_p0 = pneg %p1057_p13 }
  0x1f   : > { %v532_v13 = vmul.f32 %v921_v7, %v921_v7  ;;  %v982_v16 = vpack.c.bf16 %v922_v12, %v921_v7  ;;  %v533_v17 = vmul.f32 %v922_v12, %v922_v12  ;;  %v923_v19 = vld [vmem:[%s340_s22 + $0x30] sm:$0xff]  ;;  %v924_v20 = vld [vmem:[%s340_s22 + $0x38] sm:$0xff]  ;;  %v350_v21 = vld [vmem:[%s332_s25] sm:$0x3]  ;;  %v979_v26 = vpack.c.bf16 %v354_v15, %v353_v14  ;;  %s1327_s22 = scalar_lea.vmem %s1396_s6, %s1243_s17  ;;  %s932_s25 = sshll.u32 %s1125_s8, 5 }
  0x20   : > { %977 = vmatpush3.bf16.msra.mxu0 %v976_v9  ;;  %v519_v23 = vsel %vm518_vm1, %v514_v10, 0.0  ;;  %v520_v24 = vsel %vm518_vm1, %v515_v11, 0.0  ;;  %672 = vperm.xlu0 %1046, %v350_v21   ;;  %v522_v29 = vsel %vm518_vm1, %v516_v18, 0.0  ;;  %v985_v30 = vpack.c.bf16 %v924_v20, %v923_v19  ;;  %669 = vst.msk [vmem:[%s1327_s22] sm:$0x1] %vm668_vm7, %v1137_v2  ;;  %s1337_s12 = scalar_lea.hbm %s1395_s5, %s932_s25  ;;  %s761_s17 = scalar_lea.sflag [#allocation5], %s313_s23 }
  0x21   : > { %v536_v25 = vsel %vm518_vm1, %v532_v13, 0.0  ;;  %v521_v27 = vadd.f32 %v520_v24, %v519_v23  ;;  %983 = vmatpush3.bf16.msra.mxu1 %v982_v16  ;;  %v537_v28 = vsel %vm518_vm1, %v533_v17, 0.0  ;;  %978 = vmatprep.subr.bf16.mxu0 %v1135_v0  ;;  %v534_v32 = vmul.f32 %v923_v19, %v923_v19  ;;  %s1139_s8 = smov [#allocation4]  }
  0x22   : > { %v538_v31 = vadd.f32 %v537_v28, %v536_v25  ;;  %984 = vmatprep.subr.bf16.mxu1 %v1135_v0  ;;  %v612_v34 = vrot.slane %v350_v21, %v611_v8  ;;  %v619_v35 = vrot.slane %v350_v21, %v618_v22  ;;  %v517_v41 = vmul.f32 %v354_v15, %v354_v15 }
  0x23   : > { %v523_v33 = vadd.f32 %v522_v29, %v521_v27  ;;  %v539_v36 = vsel %vm518_vm1, %v534_v32, 0.0  ;;  %v535_v42 = vmul.f32 %v924_v20, %v924_v20  ;;  %v1298_v10 = vstv %s555_s19  ;;  %s1059_s19 = sshll.u32 %s1139_s8, 4  ;;  %s1060_s19 = int_to_ptr.vmem [resolvable:$false] %s1059_s19 }
  0x24   : > { %980 = vmatpush3.bf16.msra.mxu0 %v979_v26  ;;  %v540_v38 = vadd.f32 %v539_v36, %v538_v31  ;;  %vm613_vm3 = vcmp.eq.s32.totalorder %v612_v34, %v1250_v4  ;;  %vm620_vm4 = vcmp.eq.s32.totalorder %v619_v35, %v1250_v4  ;;  %v524_v43 = vsel %vm518_vm1, %v517_v41, 0.0  ;;  %s1061_s20 = scalar_lea.vmem %s1060_s19, 64  ;;  %p1062_p1 = scmp.lt.s32.totalorder %s1339_s27, %s1060_s19 }
  0x25   : > { %986 = vmatpush3.bf16.msra.mxu1 %v985_v30  ;;  %970 = vmatprep.subr.mxu0 %v1137_v2  ;;  %v541_v44 = vsel %vm518_vm1, %v535_v42, 0.0  ;;  %v525_v45 = vadd.f32 %v524_v43, %v523_v33  ;;  %v927_v7 = vsel %vm613_vm3, 1.0, %v1137_v2  ;;  %v928_v8 = vsel %vm620_vm4, 1.0, %v1137_v2  ;;  %p1063_p2 = scmp.lt.s32.totalorder %s1061_s20, %s1055_s14 }
  0x26   : > { %v542_v46 = vadd.f32 %v541_v44, %v540_v38  ;;  %v1300_v13 = vstv %s348_s1 }
  0x27   : > { %957 = vmatmul.mubr.msk.f32.vlgmr.msra.gmra.mrb[0].mxu0 %vm367_vm2, %v349_v37  ;;  %v526_v50 = vrot.slane %v525_v45, 4  ;;  %p1064_p3 = por %p1063_p2, %p1062_p1 }
  0x28   : > { %968 = vmatmul.mubr.msk.f32.vlgmr.msra.gmra.mrb[0].mxu1 %vm367_vm2, %v349_v37  ;;  %971 = vmatpush3.msra.mxu0 %v349_v37  ;;  %v543_v51 = vrot.slane %v542_v46, 4 }
  0x29   : > { %972 = vmatprep.mubr.msk.f32.mxu0 %vm1136_vm0, %v1137_v2  ;;  %v527_v52 = vadd.f32 %v526_v50, %v525_v45  ;;  %p1065_p5 = pnand %p1064_p3, %p1058_p0 }
  0x2a   : > { %v544_v53 = vadd.f32 %v543_v51, %v542_v46 }
  0x2b   : > { %v528_v54 = vrot.slane %v527_v52, 2 }
  0x2c   : > { %v545_v55 = vrot.slane %v544_v53, 2 }
  0x2d   : > { %v529_v56 = vadd.f32 %v528_v54, %v527_v52 }
  0x2e   : > { %v546_v57 = vadd.f32 %v545_v55, %v544_v53 }
  0x2f   : > { %v530_v58 = vrot.slane %v529_v56, 1 }
  0x30   : > { %v547_v59 = vrot.slane %v546_v57, 1 }
  0x31   : > { %v531_v60 = vadd.f32 %v530_v58, %v529_v56 }
  0x32   : > { %v548_v61 = vadd.f32 %v547_v59, %v546_v57 }
  0x3f   : > { %369 = vadd.xlane.f32.xlu0 %v368_v40 }
  0x9f   : > { %v673_v48 = vpop.permute.xlu0 %672 }
  0xa0   : > { %vm674_vm6 = vcmp.eq.s32.totalorder %v673_v48, %v1279_v47 }
  0xa1   : > { %v929_v49 = vsel %vm674_vm6, 1.0, %v1137_v2 }
  0xa2   : > { %973 = vmatmul.mubr.msk.f32.vlgmr.msra.gmra.mrb[2].mxu0 %vm677_vm5, %v929_v49 }
  0xcc   : > { %v370_v62 = vpop.xlane.xlu0 %369 }
  0xcd   : > { %v549_v63 = vadd.f32 %v531_v60, %v370_v62  ;;  %v552_v1 = vadd.f32 %v548_v61, %v370_v62 }
  0xfa   : > { %v440_v0 = vpop.f32.mrb[0].mxu0 }
  0xfb   : > { %v550_v3 = vmul.f32 2.0, %v440_v0  ;;  %v510_v5 = vpop.f32.mrb[0].mxu1  ;;  %v958_v6 = vpop.f32.mrb[1].mxu0 }
  0xfc   : > { %v553_v9 = vmul.f32 2.0, %v510_v5  ;;  %v969_v11 = vpop.f32.mrb[1].mxu1 }
  0xfd   : > { %v551_v12 = vsub.f32 %v549_v63, %v550_v3 }
  0xfe   : > { %v554_v14 = vsub.f32 %v552_v1, %v553_v9 }
  0xff   : > { %v557_v15 = vmul.f32 %v1298_v10, %v551_v12  ;;  %v623_v16 = vmul.f32 %v927_v7, %v551_v12  ;;  %v639_v17 = vmul.f32 %v928_v8, %v551_v12 }
 0x100   : > { %v560_v18 = vmul.f32 %v1298_v10, %v554_v14  ;;  %v631_v19 = vmul.f32 %v927_v7, %v554_v14  ;;  %v647_v20 = vmul.f32 %v928_v8, %v554_v14 }
 0x101   : > { %v559_v21 = vadd.f32 %v1300_v13, %v557_v15  ;;  %v624_v4 = vsel %vm518_vm1, %v623_v16, 0.0  ;;  %v640_v22 = vsel %vm518_vm1, %v639_v17, 0.0 }
 0x102   : > { %v561_v23 = vadd.f32 %v560_v18, %v1300_v13  ;;  %v625_v24 = vrot.slane %v624_v4, 4  ;;  %v632_v25 = vsel %vm518_vm1, %v631_v19, 0.0  ;;  %v641_v26 = vrot.slane %v640_v22, 4 }
 0x103   : > { %v562_v27 = vsel %vm518_vm1, %v559_v21, -inf  ;;  %v633_v28 = vrot.slane %v632_v25, 4  ;;  %v648_v29 = vsel %vm518_vm1, %v647_v20, 0.0 }
 0x104   : > { %v563_v30 = vrot.slane %v562_v27, 4  ;;  %v569_v31 = vsel %vm518_vm1, %v561_v23, -inf  ;;  %v626_v32 = vadd.f32 %v625_v24, %v624_v4  ;;  %v642_v33 = vadd.f32 %v641_v26, %v640_v22 }
 0x105   : > { %v570_v34 = vrot.slane %v569_v31, 4  ;;  %v634_v35 = vadd.f32 %v633_v28, %v632_v25  ;;  %v649_v36 = vrot.slane %v648_v29, 4 }
 0x106   : > { %v627_v37 = vrot.slane %v626_v32, 2  ;;  %v643_v38 = vrot.slane %v642_v33, 2  ;;  %v564_v39 = vmax.f32 %v562_v27, %v563_v30 }
 0x107   : > { %v635_v40 = vrot.slane %v634_v35, 2  ;;  %v650_v41 = vadd.f32 %v649_v36, %v648_v29  ;;  %v571_v42 = vmax.f32 %v569_v31, %v570_v34 }
 0x108   : > { %v628_v43 = vadd.f32 %v627_v37, %v626_v32  ;;  %v644_v44 = vadd.f32 %v643_v38, %v642_v33  ;;  %v565_v45 = vrot.slane %v564_v39, 2 }
 0x109   : > { %v636_v46 = vadd.f32 %v635_v40, %v634_v35  ;;  %v651_v48 = vrot.slane %v650_v41, 2  ;;  %v572_v49 = vrot.slane %v571_v42, 2 }
 0x10a   : > { %v566_v50 = vmax.f32 %v564_v39, %v565_v45  ;;  %v629_v51 = vrot.slane %v628_v43, 1  ;;  %v645_v52 = vrot.slane %v644_v44, 1 }
 0x10b   : > { %v652_v53 = vadd.f32 %v651_v48, %v650_v41  ;;  %v573_v54 = vmax.f32 %v571_v42, %v572_v49  ;;  %v637_v55 = vrot.slane %v636_v46, 1 }
 0x10c   : > { %v567_v56 = vrot.slane %v566_v50, 1  ;;  %v646_v57 = vadd.f32 %v645_v52, %v644_v44  ;;  %v630_v59 = vadd.f32 %v629_v51, %v628_v43 }
 0x10d   : > { %v574_v58 = vrot.slane %v573_v54, 1  ;;  %v638_v60 = vadd.f32 %v637_v55, %v636_v46  ;;  %v653_v61 = vrot.slane %v652_v53, 1 }
 0x10e   : > { %v568_v62 = vmax.f32 %v566_v50, %v567_v56 }
 0x10f   : > { %v575_v63 = vmax.f32 %v573_v54, %v574_v58  ;;  %v654_v0 = vadd.f32 %v653_v61, %v652_v53  ;;  %v656_v1 = vadd.f32 %v646_v57, %v638_v60 }
 0x110   : > { %v576_v3 = vsub.f32 %v559_v21, %v568_v62 }
 0x111   : > { %v589_v5 = vsub.f32 %v561_v23, %v575_v63  ;;  %v655_v6 = vadd.f32 %v654_v0, %v630_v59 }
 0x112   : > { %v577_v7 = vmul.f32 1.442695, %v576_v3 }
 0x113   : > { %v590_v8 = vmul.f32 1.442695, %v589_v5  ;;  %v657_v9 = vmin.f32 %v655_v6, %v656_v1 }
 0x114   : > { %1047 = vpow2.f32 %v577_v7 }
 0x115   : > { %1049 = vpow2.f32 %v590_v8  ;;  %v658_v11 = vmul.f32 %v657_v9, %v1298_v10 }
 0x117   : > { %v659_v12 = vadd.f32 %v658_v11, %v1300_v13 }
 0x119   : > { %v660_v14 = vsel %vm365_vm8, %v659_v12, 0.0 }
 0x11a   : > { %v661_v37 = vsel %vm518_vm1, %v660_v14, 0.0 }
 0x11e   : > { %v1048_v15 = vpop.eup %1047 }
 0x11f   : > { %v1050_v16 = vpop.eup %1049  ;;  %v579_v17 = vsel %vm518_vm1, %v1048_v15, 0.0 }
 0x120   : > { %v580_v18 = vrot.slane %v579_v17, 4  ;;  %v592_v19 = vsel %vm518_vm1, %v1050_v16, 0.0 }
 0x121   : > { %v593_v20 = vrot.slane %v592_v19, 4 }
 0x122   : > { %v581_v21 = vadd.f32 %v580_v18, %v579_v17 }
 0x123   : > { %v594_v4 = vadd.f32 %v593_v20, %v592_v19 }
 0x124   : > { %v582_v22 = vrot.slane %v581_v21, 2 }
 0x125   : > { %v595_v23 = vrot.slane %v594_v4, 2 }
 0x126   : > { %v583_v10 = vadd.f32 %v582_v22, %v581_v21 }
 0x127   : > { %v596_v24 = vadd.f32 %v595_v23, %v594_v4 }
 0x128   : > { %v584_v25 = vrot.slane %v583_v10, 1 }
 0x129   : > { %v597_v26 = vrot.slane %v596_v24, 1 }
 0x12a   : > { %v585_v13 = vadd.f32 %v584_v25, %v583_v10 }
 0x12b   : > { %v598_v27 = vadd.f32 %v597_v26, %v596_v24 }
 0x12c   : > { %1051 = vlog2.f32 %v585_v13 }
 0x12d   : > { %1053 = vlog2.f32 %v598_v27 }
 0x136   : > { %v1052_v28 = vpop.eup %1051 }
 0x137   : > { %v1054_v29 = vpop.eup %1053  ;;  %v587_v30 = vmul.f32 0.6931472, %v1052_v28 }
 0x138   : > { %v600_v31 = vmul.f32 0.6931472, %v1054_v29 }
 0x139   : > { %v588_v32 = vadd.f32 %v587_v30, %v568_v62 }
 0x13a   : > { %v601_v33 = vadd.f32 %v600_v31, %v575_v63 }
 0x13c   : > { %v602_v34 = vadd.f32 %v601_v33, %v588_v32 }
 0x13e   : > { %v603_v35 = vsel %vm365_vm8, %v602_v34, 0.0 }
 0x13f   : > { %v604_v36 = vsel %vm518_vm1, %v603_v35, 0.0 }
 0x140   : > { %605 = vadd.xlane.f32.xlu1 %v604_v36 }
 0x144   : > { %662 = vadd.xlane.f32.xlu1 %v661_v37 }
 0x175   : > { %v747_v47 = vpop.f32.mrb[2].mxu0 }
 0x176   : > { %752 = vst.msk [vmem:[%s315_s26] sm:$0x3] %vm751_vm9, %v747_v47  ;;  %v974_v38 = vpop.f32.mrb[3].mxu0 }
 0x177   : > { %1068 = shalt.err (!%p1065_p5)
}
 0x178   : > { %s1069_s21 = scalar_lea.hbm %s1337_s12, 32  ;;  %s1073_s25 = scalar_lea.hbm %s1395_s5, 64 }
 0x179   : > { %p1070_p6 = scmp.ne.s32.totalorder %s1337_s12, %s1069_s21  ;;  %p1074_p10 = scmp.lt.u32.totalorder %s1337_s12, %s1395_s5 }
 0x17a   : > { %p1075_p11 = scmp.lt.u32.totalorder %s1073_s25, %s1069_s21  ;;  %p1077_p13 = scmp.lt.u32.totalorder %s1069_s21, %s1337_s12 }
 0x17b   : > { %p1071_p7 = pnand %p1070_p6, %p1226_p4 }
 0x17c   : > { %p1076_p12 = por %p1075_p11, %p1074_p10 }
 0x17d   : > { %p1072_p9 = pneg %p1071_p7 }
 0x17e   : > { %p1078_p0 = por %p1077_p13, %p1076_p12 }
 0x180   : > { %p1079_p1 = pnand %p1078_p0, %p1072_p9 }
 0x182   : > { %1082 = shalt.err (!%p1079_p1)
}
 0x183   : > { %987 = dma.vmem_to_hbm [thread:$0]  (%p1226_p4), %s1339_s27, 32, %s1337_s12, %s761_s17   ;;  %v757_v2 = vld [vmem:[%s1287_s18] sm:$0x1] }
 0x184   : > { %v753_v41 = vld [vmem:[%s1327_s22] sm:$0x1] }
 0x1cd   : > { %v606_v39 = vpop.xlane.xlu1 %605 }
 0x1ce   : > { %v758_v40 = vadd.f32 %v757_v2, %v606_v39 }
 0x1d0   : > { %759 = vst.msk [vmem:[%s1287_s18] sm:$0x1] %vm668_vm7, %v758_v40 }
 0x1d1   : > { %v663_v42 = vpop.xlane.xlu1 %662 }
 0x1d2   : > { %v754_v43 = vadd.f32 %v753_v41, %v663_v42 }
 0x1d4   : > { %756 = vst.msk [vmem:[%s1327_s22] sm:$0x1] %vm668_vm7, %v754_v43 }
 0x1d5 PF: > { %p993_p2 = scmp.ge.s32.totalorder %s1133_s10, 2  ;;  %s798_s13 = sand.u32 1, %s1113_s28  }
 0x1d6   : > { %s799_s1 = scalar_lea.sflag [#allocation5], %s798_s13 }
 0x1d7   : > { %p990_p3 = pnand %p993_p2, %p1233_p8 }
 0x1d9   : > { %1108 = dma.done.wait (!%p990_p3), %s799_s1, 32  }
 0x1da   : > { %1110 = vsyncadd (!%p990_p3), %s799_s1, 4294967264  ;;  %s23_s10 = sadd.s32 1, %s1133_s10   ;;  %s1400_s28 = smov %s1117_s29 }
 0x1db   : > { %p20_p4 = scmp.ge.s32.totalorder %s23_s10, 4   ;;  %s1401_s29 = smov %s1121_s30 }
 0x1dc   : > { %s1402_s30 = smov %s1239_s16  ;;  %s1403_s8 = smov %s1129_s9 }
 0x1dd   : > { %s1404_s9 = smov %s1406_s11  ;;  %22 = sbr.rel (!%p20_p4) target bundleno = 7 (0x7), region = 107 }
 0x1e4   :  { %816 = vsyncpa [#allocation5], 1 }
 0x1e5   :  { %818 = vsyncpa [#allocation5 + $0x1], 1 }

</bundles_post_ra>
